<compile_context>
chip_gen: v7x
topology: tpu7x:2x2x1
jax: 0.10.0
libtpu: 0.0.40
codegen_flags: <defaults>
</compile_context>

<pallas_src>
import jax
import jax.numpy as jnp
from jax import lax
from jax.experimental import pallas as pl
from jax.experimental.pallas import tpu as pltpu


# ----------------------------------------------------------------------------
# Pallas kernel: TB batch elements per grid step.
#   x_ref  : (TB, L, E)      bfloat16   time-major input
#   xe_ref : (TB, L//2, E)   bfloat16   even time rows  x[:, 0::2, :]
#   xo_ref : (TB, L//2, E)   bfloat16   odd  time rows  x[:, 1::2, :]
#   w_ref  : (8*E, D_pad)    bfloat16   folded weights (tap-major along K)
#   o_ref  : (TB, L, D_pad)  out dtype
# ----------------------------------------------------------------------------
def series_convs_kernel(x_ref, xe_ref, xo_ref, w_ref, o_ref):
    tb = x_ref.shape[0]
    w = w_ref[...]                                    # one weight load per step

    def body(b, carry):
        x = x_ref[b]                                  # (L, E) bf16
        xe = xe_ref[b]                                # (L//2, E)
        xo = xo_ref[b]

        # Pool branch in the transposed (L, E) view:
        # rows [0, L/2) = maxpool(2), rows [L/2, L) = avgpool(2).
        pool_t = jnp.concatenate(
            [jnp.maximum(xe, xo), (xe + xo) * 0.5], axis=0)         # (L, E)

        # Circular taps (shift +3..-3) + pool concatenated along K, so the
        # whole batch element is ONE MXU matmul with f32 accumulation.
        # Block j multiplies folded weight rows [j*E:(j+1)*E] (shift = 3 - j).
        x_cat = jnp.concatenate(
            [jnp.roll(x, 3, axis=0), jnp.roll(x, 2, axis=0),
             jnp.roll(x, 1, axis=0), x,
             jnp.roll(x, -1, axis=0), jnp.roll(x, -2, axis=0),
             jnp.roll(x, -3, axis=0), pool_t], axis=1)              # (L, 8E)

        acc = jnp.dot(x_cat, w, preferred_element_type=jnp.float32)
        o_ref[b] = acc.astype(o_ref.dtype)
        return carry

    lax.fori_loop(0, tb, body, 0)


# ----------------------------------------------------------------------------
# Wrapper: weight folding / layout prep is glue; the matmuls live in the kernel.
# ----------------------------------------------------------------------------
def block_forward(x, params, tb=32, out_dtype=None):
    B, L, E = x.shape
    D = params["w1"].shape[0]
    if L % 2:
        raise ValueError("win_size must be even (MaxPool1d/AvgPool1d(2) + cat).")
    out_dtype = jnp.dtype(x.dtype if out_dtype is None else out_dtype)

    # --- transposed weight views (in_ch, out_ch) for right-multiplication ---
    w1t = jnp.transpose(params["w1"][:, :, 0])                 # (E, D)
    w3t = jnp.transpose(params["w3"], (2, 1, 0))               # (3, E, D)
    w7t = jnp.transpose(params["w7"], (2, 1, 0))               # (7, E, D)
    wp = params["wp"][:, :, 0]                                 # (D, 2E + 3D)
    wp_id = jnp.transpose(wp[:, 0:E])                          # (E, D)
    wp_c1 = jnp.transpose(wp[:, E:E + D])                      # (D, D)
    wp_c3 = jnp.transpose(wp[:, E + D:E + 2 * D])              # (D, D)
    wp_c7 = jnp.transpose(wp[:, E + 2 * D:E + 3 * D])          # (D, D)
    wp_pool = jnp.transpose(wp[:, E + 3 * D:])                 # (E, D)

    # --- fold the 1x1 projection into the 7 circular taps (exact, f32) ---
    # w_eff[j] corresponds to roll shift s = 3 - j.
    w_eff = jnp.einsum("ked,df->kef", w7t, wp_c7)              # (7, E, D)
    w_eff = w_eff.at[2:5].add(jnp.einsum("ked,df->kef", w3t, wp_c3))
    w_eff = w_eff.at[3].add(jnp.dot(w1t, wp_c1) + wp_id)
    w_all = jnp.concatenate([w_eff, wp_pool[None]], axis=0)    # (8, E, D)

    # --- lane-dense output: pad D up to a multiple of 128; flatten K ---
    d_pad = max(128, -(-D // 128) * 128)
    if d_pad != D:
        w_all = jnp.pad(w_all, ((0, 0), (0, 0), (0, d_pad - D)))
    w_flat = w_all.reshape(8 * E, d_pad).astype(jnp.bfloat16)  # (8E, D_pad)

    # --- bf16 inputs; even/odd time rows via a free row-major reshape ---
    x_bf = x.astype(jnp.bfloat16)
    x_pairs = x_bf.reshape(B, L // 2, 2, E)
    x_even = x_pairs[:, :, 0, :]                               # (B, L//2, E)
    x_odd = x_pairs[:, :, 1, :]

    # --- TB: as large as the per-generation VMEM budget allows ---
    try:
        vmem_cap = int(pltpu.get_tpu_info().vmem_capacity_bytes)
    except Exception:
        vmem_cap = 64 * 1024 * 1024          # conservative fallback (v7x core)
    budget = int(0.75 * vmem_cap)

    out_size = out_dtype.itemsize
    per_b = (2 * (L * E * 2)                 # x block (bf16, double-buffered)
             + 2 * (L * E * 2)               # even+odd blocks (double-buffered)
             + 2 * (L * d_pad * out_size))   # out block (double-buffered)
    w_bytes = 2 * (8 * E * d_pad * 2)
    slack = 4 * 1024 * 1024                  # in-kernel temporaries (x_cat, acc)
    tb_fit = max(1, (budget - w_bytes - slack) // per_b)

    tb = max(1, min(int(tb), int(tb_fit), B))
    if B >= 2:
        tb = min(tb, -(-B // 2))             # grid length >= 2 (v7x megacore)
    b_pad = -(-B // tb) * tb

    def bpad(a):
        if b_pad == B:
            return a
        return jnp.pad(a, ((0, b_pad - B),) + ((0, 0),) * (a.ndim - 1))

    est = w_bytes + tb * per_b + slack
    vmem_limit = int(min(budget, max(32 * 1024 * 1024, 2 * est)))

    grid_spec = pltpu.PrefetchScalarGridSpec(
        num_scalar_prefetch=0,
        grid=(b_pad // tb,),
        in_specs=[
            pl.BlockSpec((tb, L, E), lambda i: (i, 0, 0)),
            pl.BlockSpec((tb, L // 2, E), lambda i: (i, 0, 0)),
            pl.BlockSpec((tb, L // 2, E), lambda i: (i, 0, 0)),
            pl.BlockSpec((8 * E, d_pad), lambda i: (0, 0)),     # grid-invariant
        ],
        out_specs=pl.BlockSpec((tb, L, d_pad), lambda i: (i, 0, 0)),
    )

    out = pl.pallas_call(
        series_convs_kernel,
        out_shape=jax.ShapeDtypeStruct((b_pad, L, d_pad), out_dtype),
        grid_spec=grid_spec,
        compiler_params=pltpu.CompilerParams(
            dimension_semantics=("parallel",),
            vmem_limit_bytes=vmem_limit),
    )(bpad(x_bf), bpad(x_even), bpad(x_odd), w_flat)

    return out[:B, :, :D]


# ----------------------------------------------------------------------------
# Deterministic parameter init (Kaiming-normal, fan_in, leaky_relu gain).
# ----------------------------------------------------------------------------
def init_params(key, enc_in, d_model):
    gain = (2.0 / (1.0 + 0.01 ** 2)) ** 0.5

    def kaiming(k, shape):
        fan_in = shape[1] * shape[2]
        return jax.random.normal(k, shape, jnp.float32) * (gain / fan_in ** 0.5)

    k1, k3, k7, kp = jax.random.split(key, 4)
    c_total = enc_in * 2 + d_model * 3
    return {
        "w1": kaiming(k1, (d_model, enc_in, 1)),
        "w3": kaiming(k3, (d_model, enc_in, 3)),
        "w7": kaiming(k7, (d_model, enc_in, 7)),
        "wp": kaiming(kp, (d_model, c_total, 1)),
    }


# ----------------------------------------------------------------------------
# Pure-JAX reference (independent path via lax.conv, f32) for validation.
# ----------------------------------------------------------------------------
def ref_forward(x, params):
    B, L, E = x.shape
    xT = jnp.transpose(x, (0, 2, 1))  # (B, E, L)
    dn = ("NCH", "OIH", "NCH")

    def conv(inp, w):
        return lax.conv_general_dilated(inp, w, (1,), "VALID",
                                        dimension_numbers=dn)

    def circ_conv(inp, w, pad):
        xp = jnp.pad(inp, ((0, 0), (0, 0), (pad, pad)), mode="wrap")
        return conv(xp, w)

    c1 = conv(xT, params["w1"])
    c3 = circ_conv(xT, params["w3"], 1)
    c7 = circ_conv(xT, params["w7"], 3)
    xr = xT.reshape(B, E, L // 2, 2)
    max_f = jnp.max(xr, axis=-1)
    avg_f = jnp.mean(xr, axis=-1)
    pool_f = jnp.concatenate([max_f, avg_f], axis=-1)
    feats = jnp.concatenate([xT, c1, c3, c7, pool_f], axis=1)
    out = conv(feats, params["wp"])
    return jnp.transpose(out, (0, 2, 1))


if __name__ == "__main__":
    batch, win_size, enc_in, d_model = 2, 8, 4, 8

    key = jax.random.PRNGKey(0)
    kx, kp = jax.random.split(key)
    x = jax.random.normal(kx, (batch, win_size, enc_in), jnp.float32)
    params = init_params(kp, enc_in, d_model)

    out = jax.block_until_ready(block_forward(x, params))
    ref = jax.block_until_ready(ref_forward(x, params))

    assert out.shape == (batch, win_size, d_model)
    err = float(jnp.max(jnp.abs(out - ref)))
    assert jnp.allclose(out, ref, atol=5e-2, rtol=5e-2), f"max abs err = {err}"
    print("KERNEL_OK")
</pallas_src>

<mosaic_0001>
module attributes {stable_mosaic.version = 11 : i64} {
  func.func @series_convs_kernel(%arg0: i32, %arg1: memref<1x8x4xbf16, #tpu.memory_space<vmem>>, %arg2: memref<1x4x4xbf16, #tpu.memory_space<vmem>>, %arg3: memref<1x4x4xbf16, #tpu.memory_space<vmem>>, %arg4: memref<32x128xbf16, #tpu.memory_space<vmem>>, %arg5: memref<1x8x128xf32, #tpu.memory_space<vmem>>) attributes {dimension_semantics = [#tpu.dimension_semantics<parallel>], iteration_bounds = array<i64: 2>, scalar_prefetch = 0 : i64, scratch_operands = 0 : i64, tpu.core_type = #tpu.core_type<tc>, window_params = [{transform_indices = @transform_0, window_bounds = array<i64: 1, 8, 4>}, {transform_indices = @transform_1, window_bounds = array<i64: 1, 4, 4>}, {transform_indices = @transform_2, window_bounds = array<i64: 1, 4, 4>}, {pipeline_mode = #tpu.pipeline_mode<synchronous>, transform_indices = @transform_3, window_bounds = array<i64: 32, 128>}, {transform_indices = @transform_4, window_bounds = array<i64: 1, 8, 128>}]} {
    %c0 = arith.constant 0 : index
    %c0_0 = arith.constant 0 : index
    %0 = vector.load %arg4[%c0, %c0_0] : memref<32x128xbf16, #tpu.memory_space<vmem>>, vector<32x128xbf16>
    %c0_i32 = arith.constant 0 : i32
    %1 = arith.index_cast %c0_i32 : i32 to index
    %c0_1 = arith.constant 0 : index
    %c0_2 = arith.constant 0 : index
    %2 = vector.load %arg1[%1, %c0_1, %c0_2] : memref<1x8x4xbf16, #tpu.memory_space<vmem>>, vector<1x8x4xbf16>
    %3 = vector.shape_cast %2 : vector<1x8x4xbf16> to vector<8x4xbf16>
    %4 = arith.index_cast %c0_i32 : i32 to index
    %c0_3 = arith.constant 0 : index
    %c0_4 = arith.constant 0 : index
    %5 = vector.load %arg2[%4, %c0_3, %c0_4] : memref<1x4x4xbf16, #tpu.memory_space<vmem>>, vector<1x4x4xbf16>
    %6 = vector.shape_cast %5 : vector<1x4x4xbf16> to vector<4x4xbf16>
    %7 = arith.index_cast %c0_i32 : i32 to index
    %c0_5 = arith.constant 0 : index
    %c0_6 = arith.constant 0 : index
    %8 = vector.load %arg3[%7, %c0_5, %c0_6] : memref<1x4x4xbf16, #tpu.memory_space<vmem>>, vector<1x4x4xbf16>
    %9 = vector.shape_cast %8 : vector<1x4x4xbf16> to vector<4x4xbf16>
    %10 = arith.maximumf %6, %9 : vector<4x4xbf16>
    %11 = arith.addf %6, %9 : vector<4x4xbf16>
    %cst = arith.constant 5.000000e-01 : bf16
    %12 = vector.broadcast %cst : bf16 to vector<4x4xbf16>
    %13 = arith.mulf %11, %12 : vector<4x4xbf16>
    %14 = tpu.concatenate %10, %13 in 0 : vector<4x4xbf16>, vector<4x4xbf16> -> vector<8x4xbf16>
    %15 = vector.extract_strided_slice %3 {offsets = [5, 0], sizes = [3, 4], strides = [1, 1]} : vector<8x4xbf16> to vector<3x4xbf16>
    %16 = vector.extract_strided_slice %3 {offsets = [0, 0], sizes = [5, 4], strides = [1, 1]} : vector<8x4xbf16> to vector<5x4xbf16>
    %17 = tpu.concatenate %15, %16 in 0 : vector<3x4xbf16>, vector<5x4xbf16> -> vector<8x4xbf16>
    %18 = vector.extract_strided_slice %3 {offsets = [6, 0], sizes = [2, 4], strides = [1, 1]} : vector<8x4xbf16> to vector<2x4xbf16>
    %19 = vector.extract_strided_slice %3 {offsets = [0, 0], sizes = [6, 4], strides = [1, 1]} : vector<8x4xbf16> to vector<6x4xbf16>
    %20 = tpu.concatenate %18, %19 in 0 : vector<2x4xbf16>, vector<6x4xbf16> -> vector<8x4xbf16>
    %21 = vector.extract_strided_slice %3 {offsets = [7, 0], sizes = [1, 4], strides = [1, 1]} : vector<8x4xbf16> to vector<1x4xbf16>
    %22 = vector.extract_strided_slice %3 {offsets = [0, 0], sizes = [7, 4], strides = [1, 1]} : vector<8x4xbf16> to vector<7x4xbf16>
    %23 = tpu.concatenate %21, %22 in 0 : vector<1x4xbf16>, vector<7x4xbf16> -> vector<8x4xbf16>
    %24 = vector.extract_strided_slice %3 {offsets = [1, 0], sizes = [7, 4], strides = [1, 1]} : vector<8x4xbf16> to vector<7x4xbf16>
    %25 = vector.extract_strided_slice %3 {offsets = [0, 0], sizes = [1, 4], strides = [1, 1]} : vector<8x4xbf16> to vector<1x4xbf16>
    %26 = tpu.concatenate %24, %25 in 0 : vector<7x4xbf16>, vector<1x4xbf16> -> vector<8x4xbf16>
    %27 = vector.extract_strided_slice %3 {offsets = [2, 0], sizes = [6, 4], strides = [1, 1]} : vector<8x4xbf16> to vector<6x4xbf16>
    %28 = vector.extract_strided_slice %3 {offsets = [0, 0], sizes = [2, 4], strides = [1, 1]} : vector<8x4xbf16> to vector<2x4xbf16>
    %29 = tpu.concatenate %27, %28 in 0 : vector<6x4xbf16>, vector<2x4xbf16> -> vector<8x4xbf16>
    %30 = vector.extract_strided_slice %3 {offsets = [3, 0], sizes = [5, 4], strides = [1, 1]} : vector<8x4xbf16> to vector<5x4xbf16>
    %31 = vector.extract_strided_slice %3 {offsets = [0, 0], sizes = [3, 4], strides = [1, 1]} : vector<8x4xbf16> to vector<3x4xbf16>
    %32 = tpu.concatenate %30, %31 in 0 : vector<5x4xbf16>, vector<3x4xbf16> -> vector<8x4xbf16>
    %33 = tpu.concatenate %17, %20, %23, %3, %26, %29, %32, %14 in 1 : vector<8x4xbf16>, vector<8x4xbf16>, vector<8x4xbf16>, vector<8x4xbf16>, vector<8x4xbf16>, vector<8x4xbf16>, vector<8x4xbf16>, vector<8x4xbf16> -> vector<8x32xbf16>
    %cst_7 = arith.constant dense<0.000000e+00> : vector<8x128xf32>
    %34 = tpu.matmul %33, %0, %cst_7 {dimension_numbers = #tpu.dot_dimension_numbers<[1], [0], [0], [1], [0, 0, 1, 1], [], []>} : vector<8x32xbf16>, vector<32x128xbf16>, vector<8x128xf32> -> vector<8x128xf32>
    %35 = arith.index_cast %c0_i32 : i32 to index
    %c0_8 = arith.constant 0 : index
    %c0_9 = arith.constant 0 : index
    %36 = vector.load %arg5[%35, %c0_8, %c0_9] : memref<1x8x128xf32, #tpu.memory_space<vmem>>, vector<1x8x128xf32>
    %37 = vector.shape_cast %36 : vector<1x8x128xf32> to vector<8x128xf32>
    %38 = vector.shape_cast %34 : vector<8x128xf32> to vector<1x8x128xf32>
    tpu.vector_store %arg5[%35, %c0_8, %c0_9], %38 {strides = array<i32>} : memref<1x8x128xf32, #tpu.memory_space<vmem>>, vector<1x8x128xf32>,
    %c1_i32 = arith.constant 1 : i32
    return
  }
  func.func @transform_0(%arg0: i32) -> (i32, i32, i32) {
    %c0_i32 = arith.constant 0 : i32
    %c0_i32_0 = arith.constant 0 : i32
    %c0_i32_1 = arith.constant 0 : i32
    return %arg0, %c0_i32, %c0_i32_0 : i32, i32, i32
  }
  func.func @transform_1(%arg0: i32) -> (i32, i32, i32) {
    %c0_i32 = arith.constant 0 : i32
    %c0_i32_0 = arith.constant 0 : i32
    %c0_i32_1 = arith.constant 0 : i32
    return %arg0, %c0_i32, %c0_i32_0 : i32, i32, i32
  }
  func.func @transform_2(%arg0: i32) -> (i32, i32, i32) {
    %c0_i32 = arith.constant 0 : i32
    %c0_i32_0 = arith.constant 0 : i32
    %c0_i32_1 = arith.constant 0 : i32
    return %arg0, %c0_i32, %c0_i32_0 : i32, i32, i32
  }
  func.func @transform_3(%arg0: i32) -> (i32, i32) {
    %c0_i32 = arith.constant 0 : i32
    %c0_i32_0 = arith.constant 0 : i32
    %c0_i32_1 = arith.constant 0 : i32
    return %c0_i32, %c0_i32_0 : i32, i32
  }
  func.func @transform_4(%arg0: i32) -> (i32, i32, i32) {
    %c0_i32 = arith.constant 0 : i32
    %c0_i32_0 = arith.constant 0 : i32
    %c0_i32_1 = arith.constant 0 : i32
    return %arg0, %c0_i32, %c0_i32_0 : i32, i32, i32
  }
}

</mosaic_0001>

<bundles_post_ra>
// kernel: tpu_custom_call.1
= control target key start
LH: loop header
LB: loop body
LE: loop exit
PB: predicated region body
PF: predicated region fallthrough
CT: control target
= control target key end

     0   :  { %9 = vsyncpa [#allocation3], 0  ;;  %s979_s0 = inlined_call_operand.vmem [shape: bf16[2,8,4], index: 0, kind: input, shape index: {}]   ;;  %s980_s1 = inlined_call_operand.vmem [shape: bf16[2,4,4], index: 1, kind: input, shape index: {}]   ;;  %s981_s2 = inlined_call_operand.hbm [shape: bf16[2,4,4], index: 2, kind: input, shape index: {}]   ;;  %s982_s3 = inlined_call_operand.vmem [shape: bf16[32,128], index: 3, kind: input, shape index: {}]   ;;  %s983_s4 = inlined_call_operand.hbm [shape: f32[2,8,128], index: 4, kind: output, shape index: {}]  }
   0x1   :  { %11 = vsyncpa [#allocation3 + $0x1], 0 }
   0x2   :  { %12 = vsyncpa [#allocation4], 0 }
   0x3   :  { %14 = vsyncpa [#allocation4 + $0x1], 0  ;;  %s763_s15 = smov 0   ;;  %s765_s16 = smov 0  }
   0x4   :  { %s767_s17 = smov 0   ;;  %s769_s18 = smov 0  }
   0x5 LB: > { %s784_s19 = sadd.s32 4294967295, %s724_s18   ;;  %s540_s20 = sadd.s32 4294967294, %s724_s18   ;;  %s724_s18 = sphi %s769_s18, %s1004_s18   ;;  %s720_s17 = sphi %s767_s17, %s1003_s17   ;;  %s716_s16 = sphi %s765_s16, %s1002_s16   ;;  %s712_s15 = sphi %s763_s15, %s1001_s15  }
   0x6   : > { %s788_s21 = sadd.s32 1, %s724_s18   ;;  %s79_s22 = sadd.s32 1, %s720_s17 }
   0x7   : > { %s76_s23 = ssub.s32 %s724_s18, %s788_s21  ;;  %p86_p0 = scmp.ne.s32.totalorder %s720_s17, %s716_s16 }
   0x8   : > { %p77_p1 = scmp.eq.s32.totalorder %s76_s23, 0  ;;  %p87_p2 = scmp.eq.s32.totalorder %s724_s18, 0 }
   0x9   : > { %p92_p3 = scmp.ne.s32.totalorder %s716_s16, %s712_s15  ;;  %p93_p4 = scmp.eq.s32.totalorder %s784_s19, 0 }
   0xa   : > { %s800_s24 = scalar_select %p77_p1, %s720_s17, %s79_s22  }
   0xb   : > { %p802_p5 = por %p87_p2, %p86_p0  ;;  %p806_p6 = por %p93_p4, %p92_p3 }
   0xc   : > { %p137_p7 = scmp.eq.s32.totalorder %s784_s19, 1  ;;  %p143_p8 = scmp.eq.s32.totalorder %s540_s20, 1 }
   0xd   : > { %p581_p10 = scmp.lt.s32.totalorder %s724_s18, 2  ;;  %s180_s29 = sand.u32 1, %s720_s17  }
   0xe   : > { %p813_p11 = por %p137_p7, %p86_p0  ;;  %p817_p12 = por %p143_p8, %p92_p3 }
   0xf   : > { %s544_s30 = sshll.u32 %s724_s18, 5  ;;  %s543_s5 = sshll.u32 %s180_s29, 1 }
  0x10   : > { %s987_s27 = scalar_select %p813_p11, 1, 0 }
  0x11   : > { %s988_s28 = scalar_select %p817_p12, 1, 0 }
  0x12   : > { %s826_s8 = scalar_lea.hbm %s981_s2, %s544_s30  ;;  %s184_s9 = scalar_lea.vmem [#allocation2], %s543_s5 }
  0x13   : > { %s191_s10 = sshll.u32 %s184_s9, 4  ;;  %p830_p13 = pnand %p581_p10, %p802_p5  ;;  %s834_s10 = int_to_ptr.vmem [resolvable:$true] %s191_s10 }
  0x14   : > { %s181_s12 = scalar_lea.sflag [#allocation3], %s180_s29  ;;  %s628_s13 = scalar_lea.hbm %s826_s8, 32 }
  0x15   : > { %p629_p2 = scmp.ne.s32.totalorder %s826_s8, %s628_s13  ;;  %p630_p3 = pneg %p830_p13 }
  0x16   : > { %s633_s22 = scalar_lea.hbm %s981_s2, 64  ;;  %p634_p5 = scmp.lt.u32.totalorder %s826_s8, %s981_s2 }
  0x17   : > { %p631_p4 = pnand %p630_p3, %p629_p2  ;;  %p635_p8 = scmp.lt.u32.totalorder %s633_s22, %s628_s13 }
  0x18   : > { %p637_p9 = scmp.lt.u32.totalorder %s628_s13, %s826_s8 }
  0x19   : > { %p632_p7 = pneg %p631_p4  ;;  %p636_p10 = por %p635_p8, %p634_p5 }
  0x1b   : > { %p638_p0 = por %p637_p9, %p636_p10 }
  0x1d   : > { %p639_p1 = pnand %p638_p0, %p632_p7 }
  0x1f   : > { %642 = shalt.err (!%p639_p1)
}
  0x20   : > { %s643_s29 = scalar_lea.vmem %s834_s10, 32  ;;  %s726_s30 = smov [#allocation2]  }
  0x21   : > { %p644_p2 = scmp.ne.s32.totalorder %s834_s10, %s643_s29  ;;  %s648_s5 = sshll.u32 %s726_s30, 4  ;;  %s649_s5 = int_to_ptr.vmem [resolvable:$false] %s648_s5 }
  0x22   : > { %s650_s6 = scalar_lea.vmem %s649_s5, 64  ;;  %p651_p11 = scmp.lt.s32.totalorder %s834_s10, %s649_s5 }
  0x23   : > { %p646_p4 = pnand %p644_p2, %p630_p3  ;;  %p652_p5 = scmp.lt.s32.totalorder %s650_s6, %s643_s29 }
  0x25   : > { %p647_p12 = pneg %p646_p4  ;;  %p653_p8 = por %p652_p5, %p651_p11 }
  0x27   : > { %p654_p9 = pnand %p653_p8, %p647_p12 }
  0x29   : > { %657 = shalt.err (!%p654_p9)
}
  0x2a   : > { %576 = dma.hbm_to_vmem [thread:$0]  (!%p830_p13), %s826_s8, 32, %s834_s10, %s181_s12  }
  0x2b   : > { %p990_p0 = scmp.lt.s32.totalorder %s724_s18, 3  ;;  %p991_p1 = scmp.ge.s32.totalorder %s724_s18, 1 }
  0x2d   : > { %p197_p3 = pnand %p991_p1, %p990_p0 }
  0x2e   : > { %s868_s7 = sand.u32 (!%p197_p3), 1, %s716_s16  }
  0x2f   : > { %200 = sbr.rel (%p197_p3) target bundleno = 420 (0x1a4), region = 36  ;;  %s546_s9 = sshll.u32 (!%p197_p3), %s868_s7, 1 }
  0x30   : > { %s203_s13 = scalar_lea.sflag (!%p197_p3), [#allocation3], %s868_s7  ;;  %s206_s14 = scalar_lea.vmem (!%p197_p3), [#allocation2], %s546_s9 }
  0x36   : > { %703 = dma.done.wait (%p806_p6), %s203_s13, 32  }
  0x37   : > { %705 = vsyncadd (%p806_p6), %s203_s13, 4294967264  ;;  %p239_p11 = scmp.lt.s32.totalorder %s784_s19, 1  ;;  %v264_v0 = vlaneseq  ;;  %v727_v1 = vmov 1983009808   ;;  %vm294_vm0 = vcmask 1040384   ;;  %vm312_vm2 = vcmask 1043456  }
  0x38   : > { %v262_v2 = vunpack.c.l.s4 %v727_v1  ;;  %vm304_vm1 = vsmask.f32 256  ;;  %vm313_vm3 = vsmask.f32 3328  ;;  %v728_v3 = vmov 0.0   ;;  %s729_s29 = smov 12  }
  0x39   : > { %s240_s8 = scalar_select %p239_p11, %s784_s19, 1  ;;  %561 = vmatprep.subr.bf16.mxu0 %v728_v3  ;;  %vm331_vm4 = vsmask.f32 2304  ;;  %v265_v5 = vshrl.u32 %v264_v0, 7  ;;  %vm289_vm5 = vsmask.f32 1280  ;;  %vm897_vm7 = vmand %vm294_vm0, %vm304_vm1 }
  0x3a   : > { %v263_v4 = vunpack.c.0.s8 %v262_v2  ;;  %v887_v8 = vld [vmem:[%s206_s14] sm:$0x3]  ;;  %v626_v13 = vld [vmem:[%s982_s3] sm:$0xff]   ;;  %vm318_vm6 = vcmask 1042432   ;;  %v627_v22 = vld [vmem:[%s982_s3 + $0x8] sm:$0xff]   ;;  %s730_s13 = smov 4  }
  0x3b   : > { %s548_s10 = sshll.u32 %s240_s8, 2  ;;  %s549_s22 = sshll.u32 %s240_s8, 1  ;;  %562 = vmatpush3.bf16.msra.mxu0 %v626_v13  ;;  %vm314_vm8 = vmand %vm312_vm2, %vm313_vm3  ;;  %vm268_vm10 = vcmask 1041408   ;;  %vm733_vm12 = vmmov 0   ;;  %vm354_vm13 = vcmask 31744   ;;  %vm358_vm14 = vcmask 64512  }
  0x3c   : > { %s242_s20 = scalar_lea.vmem %s979_s0, %s548_s10  ;;  %s246_s25 = scalar_lea.vmem %s980_s1, %s549_s22  ;;  %v266_v16 = vsub.s32 %v263_v4, %v265_v5  ;;  %563 = vmatprep.subr.bf16.mxu0 %v728_v3  ;;  %vm909_vm9 = vmand %vm318_vm6, %vm331_vm4  ;;  %565 = vmatprep.mubr.msk.bf16.mxu0 %vm733_vm12, %v728_v3  ;;  %vm361_vm15 = vcmask 97280   ;;  %vm367_vm1 = vcmask 162816   ;;  %vm370_vm2 = vcmask 195584  }
  0x3d   : > { %v625_v6 = vld [vmem:[%s242_s20] ss:$0 sps:$4 sm:$0xff]   ;;  %s731_s14 = smov 8   ;;  %s732_s8 = smov 16   ;;  %vm922_vm11 = vmand %vm268_vm10, %vm289_vm5  ;;  %vm373_vm3 = vcmask 228352   ;;  %vm388_vm4 = vcmask 261120  }
  0x3e   : > { %v885_v7 = vld [vmem:[%s246_s25] sm:$0x3]  ;;  %v292_v9 = vrot.slane %v625_v6, 3  ;;  %v293_v10 = vrot.slane %v625_v6, 7  ;;  %340 = vrot.lane.b32.xlu1 %v625_v6, %s729_s29  ;;  %v276_v11 = vshrl.u32 %v625_v6, 16  ;;  %v279_v12 = vshll.u32 %v625_v6, 16 }
  0x3f   : > { %v316_v14 = vrot.slane %v625_v6, 1  ;;  %v257_v15 = vadd.bf16 %v887_v8, %v885_v7  ;;  %v317_v24 = vrot.slane %v625_v6, 5  ;;  %564 = vmatpush3.bf16.msra.mxu0 %v627_v22  ;;  %v256_v45 = vmax.bf16 %v887_v8, %v885_v7  ;;  %s734_s10 = smov 20   ;;  %s735_s11 = smov 24  }
  0x40   : > { %v297_v17 = vsel %vm294_vm0, %v292_v9, %v293_v10  ;;  %v298_v19 = vrot.slane %v276_v11, 3  ;;  %v300_v20 = vrot.slane %v276_v11, 7  ;;  %v307_v21 = vrot.slane %v279_v12, 1  ;;  %s736_s12 = smov 28   ;;  %s547_s20 = sshll.u32 %s868_s7, 3 }
  0x41   : > { %335 = vrot.lane.b32.xlu0 %v297_v17, %s730_s13  ;;  %v310_v23 = vrot.slane %v279_v12, 5  ;;  %v322_v25 = vrot.slane %v276_v11, 1  ;;  %v323_v26 = vrot.slane %v279_v12, 2  ;;  %v326_v29 = vrot.slane %v276_v11, 5  ;;  %s238_s22 = scalar_lea.vmem [#allocation5], %s547_s20  ;;  %s555_s23 = sshll.u32 %s784_s19, 7 }
  0x42   : > { %v301_v27 = vor.u32 %v300_v20, %v279_v12  ;;  %v308_v28 = vor.u32 %v307_v21, %v276_v11  ;;  %v327_v30 = vrot.slane %v279_v12, 6  ;;  %v258_v33 = vmul.bf16 1056980736, %v257_v15  ;;  %s446_s26 = sshll.u32 %s238_s22, 4  ;;  %s937_s30 = scalar_lea.hbm %s983_s4, %s555_s23  ;;  %s932_s26 = int_to_ptr.vmem [resolvable:$true] %s446_s26 }
  0x43   : > { %v324_v31 = vor.u32 %v323_v26, %v322_v25  ;;  %v278_v34 = vrot.slane %v276_v11, 2  ;;  %v281_v35 = vrot.slane %v279_v12, 3  ;;  %v284_v39 = vrot.slane %v276_v11, 6  ;;  %s433_s5 = scalar_lea.sflag [#allocation4], %s868_s7  ;;  %s658_s6 = scalar_lea.vmem %s932_s26, 128 }
  0x44   : > { %v306_v36 = vsel %vm897_vm7, %v298_v19, %v301_v27  ;;  %v315_v37 = vsel %vm314_vm8, %v308_v28, %v310_v23  ;;  %v328_v38 = vor.u32 %v327_v30, %v326_v29  ;;  %v260_v40 = vcombine.low %v258_v33, %v258_v33  ;;  %p659_p6 = scmp.ne.s32.totalorder %s932_s26, %s658_s6  ;;  %p998_p12 = scmp.ne.s32.totalorder %s987_s27, 0 }
  0x45   : > { %338 = vrot.lane.b32.xlu0 %v306_v36, %s731_s14  ;;  %343 = vrot.lane.b32.xlu1 %v315_v37, %s732_s8  ;;  %v282_v41 = vor.u32 %v281_v35, %v278_v34  ;;  %v285_v42 = vrot.slane %v279_v12, 7  ;;  %v321_v43 = vsel %vm318_vm6, %v316_v14, %v317_v24  ;;  %vm364_vm0 = vcmask 130048   ;;  %s737_s19 = smov [#allocation5]  }
  0x46   : > { %v333_v44 = vsel %vm909_vm9, %v324_v31, %v328_v38  ;;  %v267_v47 = vrot.slane %v260_v40, %v266_v16  ;;  %p660_p13 = pnand %p659_p6, %p998_p12  ;;  %s662_s9 = sshll.u32 %s737_s19, 4  ;;  %s663_s9 = int_to_ptr.vmem [resolvable:$false] %s662_s9 }
  0x47   : > { %v286_v48 = vor.u32 %v285_v42, %v284_v39  ;;  %s664_s13 = scalar_lea.vmem %s663_s9, 256  ;;  %p665_p10 = scmp.lt.s32.totalorder %s932_s26, %s663_s9 }
  0x48   : > { %v271_v50 = vsel %vm268_vm10, %v256_v45, %v267_v47  ;;  %p661_p7 = pneg %p660_p13  ;;  %p666_p2 = scmp.lt.s32.totalorder %s664_s13, %s658_s6 }
  0x49   : > { %346 = vrot.lane.b32.xlu0 %v321_v43, %s734_s10  ;;  %349 = vrot.lane.b32.xlu1 %v333_v44, %s735_s11  ;;  %v291_v49 = vsel %vm922_vm11, %v282_v41, %v286_v48 }
  0x4a   : > { %p667_p4 = por %p666_p2, %p665_p10 }
  0x4c   : > { %p668_p5 = pnand %p667_p4, %p661_p7 }
  0x4d   : > { %352 = vrot.lane.b32.xlu0 %v271_v50, %s736_s12 }
  0xb0   : > { %v341_v51 = vpop.permute.xlu1 %340 }
  0xb3   : > { %v336_v52 = vpop.permute.xlu0 %335 }
  0xb4   : > { %v357_v53 = vsel %vm354_vm13, %v291_v49, %v336_v52 }
  0xb7   : > { %v339_v54 = vpop.permute.xlu0 %338  ;;  %v344_v55 = vpop.permute.xlu1 %343 }
  0xb8   : > { %v360_v56 = vsel %vm358_vm14, %v357_v53, %v339_v54 }
  0xb9   : > { %v363_v57 = vsel %vm361_vm15, %v360_v56, %v341_v51 }
  0xba   : > { %v366_v58 = vsel %vm364_vm0, %v363_v57, %v344_v55 }
  0xbb   : > { %v347_v59 = vpop.permute.xlu0 %346  ;;  %v350_v61 = vpop.permute.xlu1 %349 }
  0xbc   : > { %v369_v60 = vsel %vm367_vm1, %v366_v58, %v347_v59 }
  0xbd   : > { %v372_v62 = vsel %vm370_vm2, %v369_v60, %v350_v61 }
  0xbf   : > { %v353_v63 = vpop.permute.xlu0 %352 }
  0xc0   : > { %v375_v0 = vsel %vm373_vm3, %v372_v62, %v353_v63 }
  0xc1   : > { %566 = vmatmul.mubr.msk.bf16.vlgmr.msra.gmra.mrb[0].mxu0 %vm388_vm4, %v375_v0 }
 0x194   : > { %v425_v1 = vpop.f32.mrb[0].mxu0 }
 0x195   : > { %431 = vst [vmem:[%s238_s22] sm:$0xff] %v425_v1  ;;  %v567_v2 = vpop.f32.mrb[1].mxu0 }
 0x196   : > { %v428_v3 = vpop.f32.mrb[2].mxu0 }
 0x197   : > { %671 = shalt.err (!%p668_p5)
}
 0x198   : > { %s672_s7 = scalar_lea.hbm %s937_s30, 128  ;;  %s676_s10 = scalar_lea.hbm %s983_s4, 256 }
 0x199   : > { %p673_p8 = scmp.ne.s32.totalorder %s937_s30, %s672_s7  ;;  %p677_p1 = scmp.lt.u32.totalorder %s937_s30, %s983_s4 }
 0x19a   : > { %p678_p3 = scmp.lt.u32.totalorder %s676_s10, %s672_s7  ;;  %p680_p6 = scmp.lt.u32.totalorder %s672_s7, %s937_s30 }
 0x19b   : > { %p674_p9 = pnand %p673_p8, %p998_p12 }
 0x19c   : > { %p679_p11 = por %p678_p3, %p677_p1 }
 0x19d   : > { %p675_p0 = pneg %p674_p9 }
 0x19e   : > { %p681_p13 = por %p680_p6, %p679_p11 }
 0x1a0   : > { %p682_p7 = pnand %p681_p13, %p675_p0 }
 0x1a2   : > { %685 = shalt.err (!%p682_p7)
}
 0x1a3   : > { %571 = dma.vmem_to_hbm [thread:$0]  (%p998_p12), %s932_s26, 128, %s937_s30, %s433_s5   ;;  %v568_v4 = vpop.f32.mrb[3].mxu0 }
 0x1a4 PF: > { %s458_s20 = sand.u32 1, %s712_s15   ;;  %p999_p10 = scmp.ne.s32.totalorder %s988_s28, 0 }
 0x1a5   : > { %p1000_p2 = scmp.ge.s32.totalorder %s724_s18, 2  ;;  %s459_s22 = scalar_lea.sflag [#allocation4], %s458_s20 }
 0x1a7   : > { %p578_p4 = pnand %p1000_p2, %p999_p10 }
 0x1a9   : > { %707 = dma.done.wait (!%p578_p4), %s459_s22, 128  }
 0x1aa   : > { %709 = vsyncadd (!%p578_p4), %s459_s22, 4294967168  ;;  %p17_p5 = scmp.ge.s32.totalorder %s788_s21, 4   ;;  %s1001_s15 = smov %s716_s16 }
 0x1ab   : > { %s1002_s16 = smov %s720_s17  ;;  %s1003_s17 = smov %s800_s24 }
 0x1ac   : > { %s1004_s18 = smov %s788_s21  ;;  %19 = sbr.rel (!%p17_p5) target bundleno = 5 (0x5), region = 87 }
 0x1b3   :  { %464 = vsyncpa [#allocation3], 1 }
 0x1b4   :  { %466 = vsyncpa [#allocation3 + $0x1], 1 }
 0x1b5   :  { %467 = vsyncpa [#allocation4], 1 }
 0x1b6   :  { %469 = vsyncpa [#allocation4 + $0x1], 1 }

</bundles_post_ra>
